<compile_context>
chip_gen: v6e
topology: v6e:2x2x1
jax: 0.10.0
libtpu: 0.0.40
codegen_flags: <defaults>
</compile_context>

<pallas_src>
import functools
import math

import numpy as np
import jax
import jax.numpy as jnp
from jax.experimental import pallas as pl
from jax.experimental.pallas import tpu as pltpu

THRESHOLDS = (0.5, 0.75, 0.95)
NUM_METRICS = 3 + 2 * len(THRESHOLDS)   # loss, wsum, actual_pos, (tp, pp) per thr
SLAB = 8                                # one (8, 128) f32 vreg slab per metric
ACC_ROWS = NUM_METRICS * SLAB           # 72 rows (multiple of 8)
ROW_TILE_TARGET = 1024                  # rows of 128 lanes per grid step
NEGATIVE_WEIGHT = 0.1
POSITIVE_WEIGHT = 1.0


def _cdiv(a, b):
    return -(-a // b)


def _round_up(x, m):
    return ((x + m - 1) // m) * m


def _bce_layout(n_valid):
    """Shared tiling math so target construction and the kernel wrapper agree."""
    rows = max(1, _cdiv(n_valid, 128))
    row_tile = min(ROW_TILE_TARGET, _round_up(rows, 32))
    row_blocks = _cdiv(rows, row_tile)
    rows_pad = row_blocks * row_tile
    return rows, row_tile, row_blocks, rows_pad


# ----------------------------------------------------------------------------
# Pallas kernel: weighted BCE-with-logits (reduction='sum') + binary metrics
# ----------------------------------------------------------------------------
def _bce_metrics_kernel(x_ref, t_ref, acc_ref, *, n_valid, row_blocks,
                        logit_thresholds):
    """Grid = (split, head, row_tile).

    acc_ref (1, 1, ACC_ROWS, 128) is the resident per-(split, head) accumulator.
    Metric m owns rows [8m, 8m+8): full-vreg-width partial sums; the single
    cross-sublane/cross-lane reduction happens once, outside the kernel.
    Slab order: [loss, wsum, actual_pos, tp0, pp0, tp1, pp1, tp2, pp2].
    """
    r = pl.program_id(2)
    rb = pl.program_id(0) * pl.num_programs(2) + r      # global row-block index

    @pl.when(r == 0)
    def _init():
        acc_ref[...] = jnp.zeros_like(acc_ref)

    def accumulate(masked):
        x = x_ref[0].astype(jnp.float32)     # (row_tile, 128) logits
        t = t_ref[0].astype(jnp.float32)     # (row_tile, 128) targets in {0, 1}
        tr, lanes = x.shape
        if masked:
            row = jax.lax.broadcasted_iota(jnp.int32, (tr, lanes), 0)
            lane = jax.lax.broadcasted_iota(jnp.int32, (tr, lanes), 1)
            flat = (rb * tr + row) * lanes + lane
            valid = flat < n_valid
            validf = valid.astype(jnp.float32)
            # trailing block of x may contain uninitialized (NaN/Inf) rows
            x = jnp.where(valid, x, 0.0)
            t = t * validf
            w = jnp.where(t == 1.0, POSITIVE_WEIGHT, NEGATIVE_WEIGHT) * validf
        else:
            w = jnp.where(t == 1.0, POSITIVE_WEIGHT, NEGATIVE_WEIGHT)

        # numerically stable BCE with logits: max(x,0) - x*t + log1p(exp(-|x|))
        loss = w * (jnp.maximum(x, 0.0) - x * t + jnp.log1p(jnp.exp(-jnp.abs(x))))
        slabs = [loss, w, t]
        for c in logit_thresholds:
            # (sigmoid(x) > thr)  <=>  (x > logit(thr)); sigmoid never materialized
            pred = (x > c).astype(jnp.float32)
            if masked:
                pred = pred * validf
            slabs.append(pred * t)            # true positives
            slabs.append(pred)                # predicted positives

        for m, v in enumerate(slabs):
            # sublane-grouped partial sum: pure VALU adds across vregs (no XLU)
            part = jnp.sum(v.reshape(tr // SLAB, SLAB, lanes), axis=0)
            acc_ref[0, 0, m * SLAB:(m + 1) * SLAB, :] += part

    is_last = rb == (row_blocks - 1)

    @pl.when(jnp.logical_and(rb < row_blocks, jnp.logical_not(is_last)))
    def _steady():   # hot path: no iota, no flat-index math, no mask multiplies
        accumulate(masked=False)

    @pl.when(is_last)
    def _tail():     # only the trailing row block contains padding
        accumulate(masked=True)


@jax.jit
def bce_with_logits_metrics_batched(logits_hbq, targets_flat):
    """logits_hbq: [H, B, Q] (any float dtype, cast in-kernel).
    targets_flat: [H, rows_pad*128] int8 {0,1}, already at the padded layout.
    Returns (H, NUM_METRICS) f32 reduction sums."""
    H, B, Q = logits_hbq.shape
    n_valid = B * Q
    rows, row_tile, row_blocks, rows_pad = _bce_layout(n_valid)
    assert targets_flat.shape == (H, rows_pad * 128)

    # v7x has 2 TensorCores: when a single head cannot shard on the head axis,
    # split the row range over a leading "parallel" axis instead.
    n_split = 2 if (H == 1 and row_blocks >= 2) else 1
    rps = _cdiv(row_blocks, n_split)

    # lane-dense [rows, 128] packing for the logits: only the (tiny) 128-lane
    # tail is padded host-side; trailing-row-block padding is left to Pallas
    # and masked in-kernel.
    x = logits_hbq.reshape(H, n_valid)
    if rows * 128 != n_valid:
        x = jnp.pad(x, ((0, 0), (0, rows * 128 - n_valid)))
    x = x.reshape(H, rows, 128)
    t = targets_flat.reshape(H, rows_pad, 128)

    if n_split == 1:
        in_index = lambda s, h, r: (h, r, 0)
    else:
        in_index = lambda s, h, r: (h, jnp.minimum(s * rps + r, row_blocks - 1), 0)

    kernel = functools.partial(
        _bce_metrics_kernel,
        n_valid=n_valid,
        row_blocks=row_blocks,
        logit_thresholds=tuple(math.log(th / (1.0 - th)) for th in THRESHOLDS))

    cost = pl.CostEstimate(
        flops=20 * H * n_valid,
        transcendentals=2 * H * n_valid,
        bytes_accessed=(x.size * x.dtype.itemsize + t.size * t.dtype.itemsize
                        + n_split * H * ACC_ROWS * 128 * 4))

    acc = pl.pallas_call(
        kernel,
        grid=(n_split, H, rps),
        in_specs=[pl.BlockSpec((1, row_tile, 128), in_index),
                  pl.BlockSpec((1, row_tile, 128), in_index)],
        out_specs=pl.BlockSpec((1, 1, ACC_ROWS, 128), lambda s, h, r: (s, h, 0, 0)),
        out_shape=jax.ShapeDtypeStruct((n_split, H, ACC_ROWS, 128), jnp.float32),
        compiler_params=pltpu.CompilerParams(
            dimension_semantics=("parallel", "parallel", "arbitrary")),
        cost_estimate=cost,
    )(x, t)

    # single tiny reduction (splits + sublanes + lanes), fused by XLA outside
    return acc.reshape(n_split, H, NUM_METRICS, SLAB, 128).sum(axis=(0, 3, 4))


# ----------------------------------------------------------------------------
# Host-side glue (matcher, permutation indices, cross-head aggregation)
# ----------------------------------------------------------------------------
def _safe_div(num, den):
    # torchmetrics returns 0 on zero denominator
    return jnp.where(den > 0, num / jnp.where(den > 0, den, 1.0), 0.0)


def is_multi_head_fn(keys):
    # external helper in the original code; here: multi-head iff >1 head output
    return len(list(keys)) > 1


def simple_matcher(outputs, targets):
    """Deterministic stand-in for the Hungarian matcher.

    For head h: in each batch element, the first k queries are matched (in
    order) to the k targets whose label == int(h).  Indices returned index
    into the per-head *filtered* targets, matching the original contract.
    """
    multi = is_multi_head_fn(outputs.keys())
    indices_per_head = {}
    for head_id in outputs.keys():
        per_batch = []
        for t in targets:
            labels = np.asarray(t['labels'])
            k = int(np.sum(labels == int(head_id))) if multi else int(labels.shape[0])
            per_batch.append((np.arange(k, dtype=np.int64), np.arange(k, dtype=np.int64)))
        indices_per_head[head_id] = per_batch
    return indices_per_head


class MultiHeadSetCriterion:
    def __init__(self, num_classes, matcher, losses, focal_alpha, focal_gamma,
                 weight_dict, focal_loss, multi_classification_heads=False):
        self.num_classes = num_classes
        self.matcher = matcher
        self.losses = losses
        self.focal_alpha = focal_alpha
        self.focal_gamma = focal_gamma
        self.weight_dict = weight_dict
        self.focal_loss = focal_loss
        self.multi_classification_heads = multi_classification_heads
        # deterministic buffer init (empty_weight from __init__); unused on the
        # binary_labels / center_points path but kept for parity.
        self.empty_weight = jnp.ones((num_classes + 1,), jnp.float32).at[-1].set(0.1)

    # ---- permutation helpers (host-side, like the torch versions) ----
    def _get_src_permutation_idx(self, indices):
        batch_idx = np.concatenate(
            [np.full_like(src, i) for i, (src, _) in enumerate(indices)])
        src_idx = np.concatenate([src for src, _ in indices])
        return batch_idx, src_idx

    def _get_tgt_permutation_idx(self, indices):
        batch_idx = np.concatenate(
            [np.full_like(tgt, i) for i, (_, tgt) in enumerate(indices)])
        tgt_idx = np.concatenate([tgt for _, tgt in indices])
        return batch_idx, tgt_idx

    # ---- losses ----
    def _build_binary_targets_flat(self, Q, padded_len, targets, indices):
        """{0,1} targets built *directly* at the lane-padded flat layout, as int8
        (1 B/elem HBM stream, no extra pad copy)."""
        tgt = jnp.zeros((padded_len,), jnp.int8)
        if not all(int(np.asarray(t['center_points']).size) == 0 for t in targets):
            batch_idx, src_idx = self._get_src_permutation_idx(indices)
            if batch_idx.size > 0:
                flat = np.asarray(batch_idx, np.int64) * Q + np.asarray(src_idx, np.int64)
                tgt = tgt.at[jnp.asarray(flat)].set(1)
        return tgt

    def _binary_losses_from_sums(self, s, log=True):
        """s: (NUM_METRICS,) = [loss, wsum, ap, tp0, pp0, tp1, pp1, tp2, pp2]"""
        losses = {'loss_bce': s[0], 'total_effective_samples': s[1]}
        if log:
            ap = s[2]
            for i, t in enumerate(THRESHOLDS):
                tp = s[3 + 2 * i]
                pp = s[4 + 2 * i]
                fp = pp - tp
                fn = ap - tp
                losses[f'binary_precision_{t}'] = _safe_div(tp, tp + fp)
                losses[f'binary_recall_{t}'] = _safe_div(tp, tp + fn)
                losses[f'binary_f1_{t}'] = _safe_div(2.0 * tp, 2.0 * tp + fp + fn)
        return losses

    def loss_binary_labels(self, outputs, targets, indices, num_boxes, log=True):
        assert 'pred_logits' in outputs
        src_logits = outputs['pred_logits']                       # [B, Q]
        B, Q = src_logits.shape
        _, _, _, rows_pad = _bce_layout(B * Q)
        tgt = self._build_binary_targets_flat(Q, rows_pad * 128, targets, indices)
        sums = bce_with_logits_metrics_batched(src_logits[None], tgt[None])
        return self._binary_losses_from_sums(sums[0], log=log)

    def loss_center_points(self, outputs, targets, indices, num_objects, log=True):
        assert 'pred_center_points' in outputs
        if all(int(np.asarray(t['center_points']).size) == 0 for t in targets):
            return {}
        batch_idx, src_idx = self._get_src_permutation_idx(indices)
        src_cps = outputs['pred_center_points'][jnp.asarray(batch_idx),
                                                jnp.asarray(src_idx)]      # [N, 2]
        target_cps = jnp.concatenate(
            [jnp.asarray(np.asarray(t['center_points'])[np.asarray(i)])
             for t, (_, i) in zip(targets, indices)], axis=0)              # [N, 2]
        # N is tiny and the last dim is 2: a Pallas launch (2 of 128 lanes used)
        # costs more than letting XLA fuse this sum.
        loss_cp = jnp.sum(jnp.abs(src_cps.astype(jnp.float32) -
                                  target_cps.astype(jnp.float32)))
        return {'loss_center_point': loss_cp / num_objects}

    def loss_labels(self, outputs, targets, indices, num_boxes, log=True):
        # TODO(synk): class-weighted cross-entropy path (uses empty_weight) not
        # exercised by this configuration; only binary_labels/center_points run.
        raise NotImplementedError

    def loss_labels_focal(self, outputs, targets, indices, num_boxes, log=True):
        # TODO(synk): sigmoid focal loss path not exercised by this configuration.
        raise NotImplementedError

    def get_loss(self, loss, outputs, targets, indices, num_boxes, **kwargs):
        loss_map = {'labels': self.loss_labels_focal if self.focal_loss else self.loss_labels,
                    'center_points': self.loss_center_points,
                    'binary_labels': self.loss_binary_labels}
        assert loss in loss_map, f'do you really want to compute {loss} loss?'
        return loss_map[loss](outputs, targets, indices, num_boxes, **kwargs)

    # ---- forward ----
    def forward(self, outputs, targets):
        indices_per_head = self.matcher(outputs, targets)
        num_objects = sum(len(np.asarray(t['labels'])) for t in targets)
        num_objects = jnp.asarray([num_objects], dtype=jnp.float32)
        is_multi_head = is_multi_head_fn(outputs.keys())
        number_of_type_of_objects = int(np.unique(
            np.concatenate([np.asarray(t['labels']) for t in targets])).size)

        head_ids = list(indices_per_head.keys())

        # per-head filtered targets (host-side metadata, matches torch code)
        head_targets_map = {}
        for head_id in head_ids:
            if is_multi_head:
                masks = [np.asarray(t['labels']) == int(head_id) for t in targets]
                head_targets_map[head_id] = [
                    {'center_points': np.asarray(t['center_points'])[m],
                     'labels': np.asarray(t['labels'])[m]}
                    for t, m in zip(targets, masks)]
            else:
                head_targets_map[head_id] = targets

        losses = {h: {} for h in head_ids}
        num_objects_stub = jnp.asarray([1.0], dtype=jnp.float32)

        # binary_labels fused across heads: one Pallas launch, head axis
        # "parallel" (dual TensorCore on v7x), instead of one launch per head.
        if 'binary_labels' in self.losses:
            logits_stack = jnp.stack(
                [outputs[h]['pred_logits'] for h in head_ids], axis=0)     # (H, B, Q)
            _, B, Q = logits_stack.shape
            _, _, _, rows_pad = _bce_layout(B * Q)
            tgt_stack = jnp.stack(
                [self._build_binary_targets_flat(Q, rows_pad * 128,
                                                 head_targets_map[h],
                                                 indices_per_head[h])
                 for h in head_ids], axis=0)                               # (H, rows_pad*128) int8
            sums = bce_with_logits_metrics_batched(logits_stack, tgt_stack)
            for i, h in enumerate(head_ids):
                losses[h].update(self._binary_losses_from_sums(sums[i], log=True))

        for head_id in head_ids:
            for loss in self.losses:
                if loss == 'binary_labels':
                    continue
                losses[head_id].update(
                    self.get_loss(loss, outputs[head_id], head_targets_map[head_id],
                                  indices_per_head[head_id], num_objects_stub))

        keys = set(k for v in losses.values() for k in v.keys())
        agg = {k: sum(v[k] for v in losses.values() if k in v) for k in keys}
        if 'loss_center_point' in agg:
            agg['loss_center_point'] = agg['loss_center_point'] / num_objects
        if 'loss_bce' in agg:
            agg['loss_bce'] = agg['loss_bce'] / agg['total_effective_samples']
        losses_result = {}
        for k, v in agg.items():
            if k.startswith('binary_'):
                losses_result[k] = v / number_of_type_of_objects
            else:
                losses_result[k] = v
        return losses_result

    __call__ = forward


# ----------------------------------------------------------------------------
if __name__ == "__main__":
    key = jax.random.PRNGKey(0)
    B, Q = 2, 8
    k1, k2, k3, k4 = jax.random.split(key, 4)

    # two classification/regression heads ("0" and "1")
    outputs = {
        '0': {'pred_logits': jax.random.normal(k1, (B, Q), jnp.float32),
              'pred_center_points': jax.random.uniform(k2, (B, Q, 2), jnp.float32)},
        '1': {'pred_logits': jax.random.normal(k3, (B, Q), jnp.float32),
              'pred_center_points': jax.random.uniform(k4, (B, Q, 2), jnp.float32)},
    }
    targets = [
        {'labels': np.array([0, 1, 0], dtype=np.int64),
         'center_points': np.array([[0.2, 0.3], [0.5, 0.5], [0.7, 0.1]], dtype=np.float32)},
        {'labels': np.array([1, 0], dtype=np.int64),
         'center_points': np.array([[0.4, 0.6], [0.9, 0.8]], dtype=np.float32)},
    ]

    criterion = MultiHeadSetCriterion(
        num_classes=1,
        matcher=simple_matcher,
        losses=['binary_labels', 'center_points'],
        focal_alpha=0.25,
        focal_gamma=2.0,
        weight_dict={'loss_bce': 1.0, 'loss_center_point': 1.0},
        focal_loss=False,
        multi_classification_heads=True,
    )

    result = criterion(outputs, targets)
    for v in result.values():
        if isinstance(v, jax.Array):
            jax.block_until_ready(v)
    print("KERNEL_OK")
</pallas_src>

<mosaic_0001>
module attributes {stable_mosaic.version = 11 : i64} {
  func.func @_bce_metrics_kernel(%arg0: i32, %arg1: i32, %arg2: i32, %arg3: memref<1x32x128xf32, #tpu.memory_space<vmem>>, %arg4: memref<1x32x128xi8, #tpu.memory_space<vmem>>, %arg5: memref<1x1x72x128xf32, #tpu.memory_space<vmem>>) attributes {dimension_semantics = [#tpu.dimension_semantics<parallel>, #tpu.dimension_semantics<parallel>, #tpu.dimension_semantics<arbitrary>], iteration_bounds = array<i64: 1, 2, 1>, scalar_prefetch = 0 : i64, scratch_operands = 0 : i64, tpu.core_type = #tpu.core_type<tc>, window_params = [{transform_indices = @transform_0, window_bounds = array<i64: 1, 32, 128>}, {transform_indices = @transform_1, window_bounds = array<i64: 1, 32, 128>}, {transform_indices = @transform_2, window_bounds = array<i64: 1, 1, 72, 128>}]} {
    %c1_i32 = arith.constant 1 : i32
    %0 = arith.muli %arg0, %c1_i32 : i32
    %1 = arith.addi %0, %arg2 : i32
    %c0_i32 = arith.constant 0 : i32
    %2 = arith.cmpi eq, %arg2, %c0_i32 : i32
    %3 = arith.extui %2 : i1 to i32
    %c0_i32_0 = arith.constant 0 : i32
    %4 = arith.cmpi ne, %3, %c0_i32_0 : i32
    scf.if %4 {
      %cst = arith.constant 0.000000e+00 : f32
      %13 = vector.broadcast %cst : f32 to vector<1x1x72x128xf32>
      %c0 = arith.constant 0 : index
      %c0_5 = arith.constant 0 : index
      %c0_6 = arith.constant 0 : index
      %c0_7 = arith.constant 0 : index
      %14 = vector.load %arg5[%c0, %c0_5, %c0_6, %c0_7] : memref<1x1x72x128xf32, #tpu.memory_space<vmem>>, vector<1x1x72x128xf32>
      tpu.vector_store %arg5[%c0, %c0_5, %c0_6, %c0_7], %13 {strides = array<i32>} : memref<1x1x72x128xf32, #tpu.memory_space<vmem>>, vector<1x1x72x128xf32>,
    } else {
    }
    %c0_i32_1 = arith.constant 0 : i32
    %5 = arith.cmpi eq, %1, %c0_i32_1 : i32
    %c1_i32_2 = arith.constant 1 : i32
    %6 = arith.cmpi slt, %1, %c1_i32_2 : i32
    %true = arith.constant true
    %7 = arith.xori %5, %true : i1
    %8 = arith.andi %6, %7 : i1
    %9 = arith.extui %8 : i1 to i32
    %c0_i32_3 = arith.constant 0 : i32
    %10 = arith.cmpi ne, %9, %c0_i32_3 : i32
    scf.if %10 {
      %c0 = arith.constant 0 : index
      %c0_5 = arith.constant 0 : index
      %c0_6 = arith.constant 0 : index
      %13 = vector.load %arg3[%c0, %c0_5, %c0_6] : memref<1x32x128xf32, #tpu.memory_space<vmem>>, vector<1x32x128xf32>
      %14 = vector.shape_cast %13 : vector<1x32x128xf32> to vector<32x128xf32>
      %c0_7 = arith.constant 0 : index
      %c0_8 = arith.constant 0 : index
      %c0_9 = arith.constant 0 : index
      %15 = vector.load %arg4[%c0_7, %c0_8, %c0_9] : memref<1x32x128xi8, #tpu.memory_space<vmem>>, vector<1x32x128xi8>
      %16 = vector.shape_cast %15 : vector<1x32x128xi8> to vector<32x128xi8>
      %17 = arith.sitofp %16 : vector<32x128xi8> to vector<32x128xf32>
      %cst = arith.constant 1.000000e+00 : f32
      %18 = vector.broadcast %cst : f32 to vector<32x128xf32>
      %19 = arith.cmpf oeq, %17, %18 : vector<32x128xf32>
      %cst_10 = arith.constant 1.000000e+00 : f32
      %cst_11 = arith.constant 1.000000e-01 : f32
      %20 = vector.broadcast %cst_10 : f32 to vector<32x128xf32>
      %21 = vector.broadcast %cst_11 : f32 to vector<32x128xf32>
      %22 = arith.select %19, %20, %21 : vector<32x128xi1>, vector<32x128xf32>
      %cst_12 = arith.constant 0.000000e+00 : f32
      %23 = vector.broadcast %cst_12 : f32 to vector<32x128xf32>
      %24 = arith.maximumf %14, %23 : vector<32x128xf32>
      %25 = arith.mulf %14, %17 : vector<32x128xf32>
      %26 = arith.subf %24, %25 : vector<32x128xf32>
      %27 = math.absf %14 : vector<32x128xf32>
      %cst_13 = arith.constant 0.000000e+00 : f32
      %28 = vector.broadcast %cst_13 : f32 to vector<32x128xf32>
      %29 = arith.subf %28, %27 : vector<32x128xf32>
      %30 = math.exp %29 : vector<32x128xf32>
      %31 = math.log1p %30 : vector<32x128xf32>
      %32 = arith.addf %26, %31 : vector<32x128xf32>
      %33 = arith.mulf %22, %32 : vector<32x128xf32>
      %cst_14 = arith.constant 0.000000e+00 : f32
      %34 = vector.broadcast %cst_14 : f32 to vector<32x128xf32>
      %35 = arith.cmpf ogt, %14, %34 : vector<32x128xf32>
      %36 = arith.extui %35 : vector<32x128xi1> to vector<32x128xi32>
      %37 = arith.sitofp %36 : vector<32x128xi32> to vector<32x128xf32>
      %38 = arith.mulf %37, %17 : vector<32x128xf32>
      %cst_15 = arith.constant 1.09861231 : f32
      %39 = vector.broadcast %cst_15 : f32 to vector<32x128xf32>
      %40 = arith.cmpf ogt, %14, %39 : vector<32x128xf32>
      %41 = arith.extui %40 : vector<32x128xi1> to vector<32x128xi32>
      %42 = arith.sitofp %41 : vector<32x128xi32> to vector<32x128xf32>
      %43 = arith.mulf %42, %17 : vector<32x128xf32>
      %cst_16 = arith.constant 2.94443893 : f32
      %44 = vector.broadcast %cst_16 : f32 to vector<32x128xf32>
      %45 = arith.cmpf ogt, %14, %44 : vector<32x128xf32>
      %46 = arith.extui %45 : vector<32x128xi1> to vector<32x128xi32>
      %47 = arith.sitofp %46 : vector<32x128xi32> to vector<32x128xf32>
      %48 = arith.mulf %47, %17 : vector<32x128xf32>
      %49 = vector.shape_cast %33 : vector<32x128xf32> to vector<4x8x128xf32>
      %cst_17 = arith.constant dense<0.000000e+00> : vector<8x128xf32>
      %50 = vector.multi_reduction <add>, %49, %cst_17 [0] : vector<4x8x128xf32> to vector<8x128xf32>
      %c0_18 = arith.constant 0 : index
      %c0_19 = arith.constant 0 : index
      %c0_20 = arith.constant 0 : index
      %c0_21 = arith.constant 0 : index
      %51 = vector.load %arg5[%c0_18, %c0_19, %c0_20, %c0_21] : memref<1x1x72x128xf32, #tpu.memory_space<vmem>>, vector<1x1x8x128xf32>
      %52 = vector.shape_cast %51 : vector<1x1x8x128xf32> to vector<8x128xf32>
      %53 = arith.addf %52, %50 : vector<8x128xf32>
      %c0_22 = arith.constant 0 : index
      %c0_23 = arith.constant 0 : index
      %c0_24 = arith.constant 0 : index
      %c0_25 = arith.constant 0 : index
      %54 = vector.load %arg5[%c0_22, %c0_23, %c0_24, %c0_25] : memref<1x1x72x128xf32, #tpu.memory_space<vmem>>, vector<1x1x8x128xf32>
      %55 = vector.shape_cast %54 : vector<1x1x8x128xf32> to vector<8x128xf32>
      %56 = vector.shape_cast %53 : vector<8x128xf32> to vector<1x1x8x128xf32>
      tpu.vector_store %arg5[%c0_22, %c0_23, %c0_24, %c0_25], %56 {strides = array<i32>} : memref<1x1x72x128xf32, #tpu.memory_space<vmem>>, vector<1x1x8x128xf32>,
      %57 = vector.shape_cast %22 : vector<32x128xf32> to vector<4x8x128xf32>
      %cst_26 = arith.constant dense<0.000000e+00> : vector<8x128xf32>
      %58 = vector.multi_reduction <add>, %57, %cst_26 [0] : vector<4x8x128xf32> to vector<8x128xf32>
      %c0_27 = arith.constant 0 : index
      %c0_28 = arith.constant 0 : index
      %c8 = arith.constant 8 : index
      %c0_29 = arith.constant 0 : index
      %59 = vector.load %arg5[%c0_27, %c0_28, %c8, %c0_29] : memref<1x1x72x128xf32, #tpu.memory_space<vmem>>, vector<1x1x8x128xf32>
      %60 = vector.shape_cast %59 : vector<1x1x8x128xf32> to vector<8x128xf32>
      %61 = arith.addf %60, %58 : vector<8x128xf32>
      %c0_30 = arith.constant 0 : index
      %c0_31 = arith.constant 0 : index
      %c8_32 = arith.constant 8 : index
      %c0_33 = arith.constant 0 : index
      %62 = vector.load %arg5[%c0_30, %c0_31, %c8_32, %c0_33] : memref<1x1x72x128xf32, #tpu.memory_space<vmem>>, vector<1x1x8x128xf32>
      %63 = vector.shape_cast %62 : vector<1x1x8x128xf32> to vector<8x128xf32>
      %64 = vector.shape_cast %61 : vector<8x128xf32> to vector<1x1x8x128xf32>
      tpu.vector_store %arg5[%c0_30, %c0_31, %c8_32, %c0_33], %64 {strides = array<i32>} : memref<1x1x72x128xf32, #tpu.memory_space<vmem>>, vector<1x1x8x128xf32>,
      %65 = vector.shape_cast %17 : vector<32x128xf32> to vector<4x8x128xf32>
      %cst_34 = arith.constant dense<0.000000e+00> : vector<8x128xf32>
      %66 = vector.multi_reduction <add>, %65, %cst_34 [0] : vector<4x8x128xf32> to vector<8x128xf32>
      %c0_35 = arith.constant 0 : index
      %c0_36 = arith.constant 0 : index
      %c16 = arith.constant 16 : index
      %c0_37 = arith.constant 0 : index
      %67 = vector.load %arg5[%c0_35, %c0_36, %c16, %c0_37] : memref<1x1x72x128xf32, #tpu.memory_space<vmem>>, vector<1x1x8x128xf32>
      %68 = vector.shape_cast %67 : vector<1x1x8x128xf32> to vector<8x128xf32>
      %69 = arith.addf %68, %66 : vector<8x128xf32>
      %c0_38 = arith.constant 0 : index
      %c0_39 = arith.constant 0 : index
      %c16_40 = arith.constant 16 : index
      %c0_41 = arith.constant 0 : index
      %70 = vector.load %arg5[%c0_38, %c0_39, %c16_40, %c0_41] : memref<1x1x72x128xf32, #tpu.memory_space<vmem>>, vector<1x1x8x128xf32>
      %71 = vector.shape_cast %70 : vector<1x1x8x128xf32> to vector<8x128xf32>
      %72 = vector.shape_cast %69 : vector<8x128xf32> to vector<1x1x8x128xf32>
      tpu.vector_store %arg5[%c0_38, %c0_39, %c16_40, %c0_41], %72 {strides = array<i32>} : memref<1x1x72x128xf32, #tpu.memory_space<vmem>>, vector<1x1x8x128xf32>,
      %73 = vector.shape_cast %38 : vector<32x128xf32> to vector<4x8x128xf32>
      %cst_42 = arith.constant dense<0.000000e+00> : vector<8x128xf32>
      %74 = vector.multi_reduction <add>, %73, %cst_42 [0] : vector<4x8x128xf32> to vector<8x128xf32>
      %c0_43 = arith.constant 0 : index
      %c0_44 = arith.constant 0 : index
      %c24 = arith.constant 24 : index
      %c0_45 = arith.constant 0 : index
      %75 = vector.load %arg5[%c0_43, %c0_44, %c24, %c0_45] : memref<1x1x72x128xf32, #tpu.memory_space<vmem>>, vector<1x1x8x128xf32>
      %76 = vector.shape_cast %75 : vector<1x1x8x128xf32> to vector<8x128xf32>
      %77 = arith.addf %76, %74 : vector<8x128xf32>
      %c0_46 = arith.constant 0 : index
      %c0_47 = arith.constant 0 : index
      %c24_48 = arith.constant 24 : index
      %c0_49 = arith.constant 0 : index
      %78 = vector.load %arg5[%c0_46, %c0_47, %c24_48, %c0_49] : memref<1x1x72x128xf32, #tpu.memory_space<vmem>>, vector<1x1x8x128xf32>
      %79 = vector.shape_cast %78 : vector<1x1x8x128xf32> to vector<8x128xf32>
      %80 = vector.shape_cast %77 : vector<8x128xf32> to vector<1x1x8x128xf32>
      tpu.vector_store %arg5[%c0_46, %c0_47, %c24_48, %c0_49], %80 {strides = array<i32>} : memref<1x1x72x128xf32, #tpu.memory_space<vmem>>, vector<1x1x8x128xf32>,
      %81 = vector.shape_cast %37 : vector<32x128xf32> to vector<4x8x128xf32>
      %cst_50 = arith.constant dense<0.000000e+00> : vector<8x128xf32>
      %82 = vector.multi_reduction <add>, %81, %cst_50 [0] : vector<4x8x128xf32> to vector<8x128xf32>
      %c0_51 = arith.constant 0 : index
      %c0_52 = arith.constant 0 : index
      %c32 = arith.constant 32 : index
      %c0_53 = arith.constant 0 : index
      %83 = vector.load %arg5[%c0_51, %c0_52, %c32, %c0_53] : memref<1x1x72x128xf32, #tpu.memory_space<vmem>>, vector<1x1x8x128xf32>
      %84 = vector.shape_cast %83 : vector<1x1x8x128xf32> to vector<8x128xf32>
      %85 = arith.addf %84, %82 : vector<8x128xf32>
      %c0_54 = arith.constant 0 : index
      %c0_55 = arith.constant 0 : index
      %c32_56 = arith.constant 32 : index
      %c0_57 = arith.constant 0 : index
      %86 = vector.load %arg5[%c0_54, %c0_55, %c32_56, %c0_57] : memref<1x1x72x128xf32, #tpu.memory_space<vmem>>, vector<1x1x8x128xf32>
      %87 = vector.shape_cast %86 : vector<1x1x8x128xf32> to vector<8x128xf32>
      %88 = vector.shape_cast %85 : vector<8x128xf32> to vector<1x1x8x128xf32>
      tpu.vector_store %arg5[%c0_54, %c0_55, %c32_56, %c0_57], %88 {strides = array<i32>} : memref<1x1x72x128xf32, #tpu.memory_space<vmem>>, vector<1x1x8x128xf32>,
      %89 = vector.shape_cast %43 : vector<32x128xf32> to vector<4x8x128xf32>
      %cst_58 = arith.constant dense<0.000000e+00> : vector<8x128xf32>
      %90 = vector.multi_reduction <add>, %89, %cst_58 [0] : vector<4x8x128xf32> to vector<8x128xf32>
      %c0_59 = arith.constant 0 : index
      %c0_60 = arith.constant 0 : index
      %c40 = arith.constant 40 : index
      %c0_61 = arith.constant 0 : index
      %91 = vector.load %arg5[%c0_59, %c0_60, %c40, %c0_61] : memref<1x1x72x128xf32, #tpu.memory_space<vmem>>, vector<1x1x8x128xf32>
      %92 = vector.shape_cast %91 : vector<1x1x8x128xf32> to vector<8x128xf32>
      %93 = arith.addf %92, %90 : vector<8x128xf32>
      %c0_62 = arith.constant 0 : index
      %c0_63 = arith.constant 0 : index
      %c40_64 = arith.constant 40 : index
      %c0_65 = arith.constant 0 : index
      %94 = vector.load %arg5[%c0_62, %c0_63, %c40_64, %c0_65] : memref<1x1x72x128xf32, #tpu.memory_space<vmem>>, vector<1x1x8x128xf32>
      %95 = vector.shape_cast %94 : vector<1x1x8x128xf32> to vector<8x128xf32>
      %96 = vector.shape_cast %93 : vector<8x128xf32> to vector<1x1x8x128xf32>
      tpu.vector_store %arg5[%c0_62, %c0_63, %c40_64, %c0_65], %96 {strides = array<i32>} : memref<1x1x72x128xf32, #tpu.memory_space<vmem>>, vector<1x1x8x128xf32>,
      %97 = vector.shape_cast %42 : vector<32x128xf32> to vector<4x8x128xf32>
      %cst_66 = arith.constant dense<0.000000e+00> : vector<8x128xf32>
      %98 = vector.multi_reduction <add>, %97, %cst_66 [0] : vector<4x8x128xf32> to vector<8x128xf32>
      %c0_67 = arith.constant 0 : index
      %c0_68 = arith.constant 0 : index
      %c48 = arith.constant 48 : index
      %c0_69 = arith.constant 0 : index
      %99 = vector.load %arg5[%c0_67, %c0_68, %c48, %c0_69] : memref<1x1x72x128xf32, #tpu.memory_space<vmem>>, vector<1x1x8x128xf32>
      %100 = vector.shape_cast %99 : vector<1x1x8x128xf32> to vector<8x128xf32>
      %101 = arith.addf %100, %98 : vector<8x128xf32>
      %c0_70 = arith.constant 0 : index
      %c0_71 = arith.constant 0 : index
      %c48_72 = arith.constant 48 : index
      %c0_73 = arith.constant 0 : index
      %102 = vector.load %arg5[%c0_70, %c0_71, %c48_72, %c0_73] : memref<1x1x72x128xf32, #tpu.memory_space<vmem>>, vector<1x1x8x128xf32>
      %103 = vector.shape_cast %102 : vector<1x1x8x128xf32> to vector<8x128xf32>
      %104 = vector.shape_cast %101 : vector<8x128xf32> to vector<1x1x8x128xf32>
      tpu.vector_store %arg5[%c0_70, %c0_71, %c48_72, %c0_73], %104 {strides = array<i32>} : memref<1x1x72x128xf32, #tpu.memory_space<vmem>>, vector<1x1x8x128xf32>,
      %105 = vector.shape_cast %48 : vector<32x128xf32> to vector<4x8x128xf32>
      %cst_74 = arith.constant dense<0.000000e+00> : vector<8x128xf32>
      %106 = vector.multi_reduction <add>, %105, %cst_74 [0] : vector<4x8x128xf32> to vector<8x128xf32>
      %c0_75 = arith.constant 0 : index
      %c0_76 = arith.constant 0 : index
      %c56 = arith.constant 56 : index
      %c0_77 = arith.constant 0 : index
      %107 = vector.load %arg5[%c0_75, %c0_76, %c56, %c0_77] : memref<1x1x72x128xf32, #tpu.memory_space<vmem>>, vector<1x1x8x128xf32>
      %108 = vector.shape_cast %107 : vector<1x1x8x128xf32> to vector<8x128xf32>
      %109 = arith.addf %108, %106 : vector<8x128xf32>
      %c0_78 = arith.constant 0 : index
      %c0_79 = arith.constant 0 : index
      %c56_80 = arith.constant 56 : index
      %c0_81 = arith.constant 0 : index
      %110 = vector.load %arg5[%c0_78, %c0_79, %c56_80, %c0_81] : memref<1x1x72x128xf32, #tpu.memory_space<vmem>>, vector<1x1x8x128xf32>
      %111 = vector.shape_cast %110 : vector<1x1x8x128xf32> to vector<8x128xf32>
      %112 = vector.shape_cast %109 : vector<8x128xf32> to vector<1x1x8x128xf32>
      tpu.vector_store %arg5[%c0_78, %c0_79, %c56_80, %c0_81], %112 {strides = array<i32>} : memref<1x1x72x128xf32, #tpu.memory_space<vmem>>, vector<1x1x8x128xf32>,
      %113 = vector.shape_cast %47 : vector<32x128xf32> to vector<4x8x128xf32>
      %cst_82 = arith.constant dense<0.000000e+00> : vector<8x128xf32>
      %114 = vector.multi_reduction <add>, %113, %cst_82 [0] : vector<4x8x128xf32> to vector<8x128xf32>
      %c0_83 = arith.constant 0 : index
      %c0_84 = arith.constant 0 : index
      %c64 = arith.constant 64 : index
      %c0_85 = arith.constant 0 : index
      %115 = vector.load %arg5[%c0_83, %c0_84, %c64, %c0_85] : memref<1x1x72x128xf32, #tpu.memory_space<vmem>>, vector<1x1x8x128xf32>
      %116 = vector.shape_cast %115 : vector<1x1x8x128xf32> to vector<8x128xf32>
      %117 = arith.addf %116, %114 : vector<8x128xf32>
      %c0_86 = arith.constant 0 : index
      %c0_87 = arith.constant 0 : index
      %c64_88 = arith.constant 64 : index
      %c0_89 = arith.constant 0 : index
      %118 = vector.load %arg5[%c0_86, %c0_87, %c64_88, %c0_89] : memref<1x1x72x128xf32, #tpu.memory_space<vmem>>, vector<1x1x8x128xf32>
      %119 = vector.shape_cast %118 : vector<1x1x8x128xf32> to vector<8x128xf32>
      %120 = vector.shape_cast %117 : vector<8x128xf32> to vector<1x1x8x128xf32>
      tpu.vector_store %arg5[%c0_86, %c0_87, %c64_88, %c0_89], %120 {strides = array<i32>} : memref<1x1x72x128xf32, #tpu.memory_space<vmem>>, vector<1x1x8x128xf32>,
    } else {
    }
    %11 = arith.extui %5 : i1 to i32
    %c0_i32_4 = arith.constant 0 : i32
    %12 = arith.cmpi ne, %11, %c0_i32_4 : i32
    scf.if %12 {
      %c0 = arith.constant 0 : index
      %c0_5 = arith.constant 0 : index
      %c0_6 = arith.constant 0 : index
      %13 = vector.load %arg3[%c0, %c0_5, %c0_6] : memref<1x32x128xf32, #tpu.memory_space<vmem>>, vector<1x32x128xf32>
      %14 = vector.shape_cast %13 : vector<1x32x128xf32> to vector<32x128xf32>
      %c0_7 = arith.constant 0 : index
      %c0_8 = arith.constant 0 : index
      %c0_9 = arith.constant 0 : index
      %15 = vector.load %arg4[%c0_7, %c0_8, %c0_9] : memref<1x32x128xi8, #tpu.memory_space<vmem>>, vector<1x32x128xi8>
      %16 = vector.shape_cast %15 : vector<1x32x128xi8> to vector<32x128xi8>
      %17 = arith.sitofp %16 : vector<32x128xi8> to vector<32x128xf32>
      %18 = tpu.iota {dimensions = array<i32: 0>} : vector<32x128xi32>
      %19 = tpu.iota {dimensions = array<i32: 1>} : vector<32x128xi32>
      %c32_i32 = arith.constant 32 : i32
      %20 = arith.muli %1, %c32_i32 : i32
      %21 = vector.broadcast %20 : i32 to vector<32x128xi32>
      %22 = arith.addi %21, %18 : vector<32x128xi32>
      %c128_i32 = arith.constant 128 : i32
      %23 = vector.broadcast %c128_i32 : i32 to vector<32x128xi32>
      %24 = arith.muli %22, %23 : vector<32x128xi32>
      %25 = arith.addi %24, %19 : vector<32x128xi32>
      %c16_i32 = arith.constant 16 : i32
      %26 = vector.broadcast %c16_i32 : i32 to vector<32x128xi32>
      %27 = arith.cmpi slt, %25, %26 : vector<32x128xi32>
      %28 = arith.extui %27 : vector<32x128xi1> to vector<32x128xi32>
      %29 = arith.sitofp %28 : vector<32x128xi32> to vector<32x128xf32>
      %cst = arith.constant 0.000000e+00 : f32
      %30 = vector.broadcast %cst : f32 to vector<32x128xf32>
      %31 = arith.select %27, %14, %30 : vector<32x128xi1>, vector<32x128xf32>
      %32 = arith.mulf %17, %29 : vector<32x128xf32>
      %cst_10 = arith.constant 1.000000e+00 : f32
      %33 = vector.broadcast %cst_10 : f32 to vector<32x128xf32>
      %34 = arith.cmpf oeq, %32, %33 : vector<32x128xf32>
      %cst_11 = arith.constant 1.000000e+00 : f32
      %cst_12 = arith.constant 1.000000e-01 : f32
      %35 = vector.broadcast %cst_11 : f32 to vector<32x128xf32>
      %36 = vector.broadcast %cst_12 : f32 to vector<32x128xf32>
      %37 = arith.select %34, %35, %36 : vector<32x128xi1>, vector<32x128xf32>
      %38 = arith.mulf %37, %29 : vector<32x128xf32>
      %cst_13 = arith.constant 0.000000e+00 : f32
      %39 = vector.broadcast %cst_13 : f32 to vector<32x128xf32>
      %40 = arith.maximumf %31, %39 : vector<32x128xf32>
      %41 = arith.mulf %31, %32 : vector<32x128xf32>
      %42 = arith.subf %40, %41 : vector<32x128xf32>
      %43 = math.absf %31 : vector<32x128xf32>
      %cst_14 = arith.constant 0.000000e+00 : f32
      %44 = vector.broadcast %cst_14 : f32 to vector<32x128xf32>
      %45 = arith.subf %44, %43 : vector<32x128xf32>
      %46 = math.exp %45 : vector<32x128xf32>
      %47 = math.log1p %46 : vector<32x128xf32>
      %48 = arith.addf %42, %47 : vector<32x128xf32>
      %49 = arith.mulf %38, %48 : vector<32x128xf32>
      %cst_15 = arith.constant 0.000000e+00 : f32
      %50 = vector.broadcast %cst_15 : f32 to vector<32x128xf32>
      %51 = arith.cmpf ogt, %31, %50 : vector<32x128xf32>
      %52 = arith.extui %51 : vector<32x128xi1> to vector<32x128xi32>
      %53 = arith.sitofp %52 : vector<32x128xi32> to vector<32x128xf32>
      %54 = arith.mulf %53, %29 : vector<32x128xf32>
      %55 = arith.mulf %54, %32 : vector<32x128xf32>
      %cst_16 = arith.constant 1.09861231 : f32
      %56 = vector.broadcast %cst_16 : f32 to vector<32x128xf32>
      %57 = arith.cmpf ogt, %31, %56 : vector<32x128xf32>
      %58 = arith.extui %57 : vector<32x128xi1> to vector<32x128xi32>
      %59 = arith.sitofp %58 : vector<32x128xi32> to vector<32x128xf32>
      %60 = arith.mulf %59, %29 : vector<32x128xf32>
      %61 = arith.mulf %60, %32 : vector<32x128xf32>
      %cst_17 = arith.constant 2.94443893 : f32
      %62 = vector.broadcast %cst_17 : f32 to vector<32x128xf32>
      %63 = arith.cmpf ogt, %31, %62 : vector<32x128xf32>
      %64 = arith.extui %63 : vector<32x128xi1> to vector<32x128xi32>
      %65 = arith.sitofp %64 : vector<32x128xi32> to vector<32x128xf32>
      %66 = arith.mulf %65, %29 : vector<32x128xf32>
      %67 = arith.mulf %66, %32 : vector<32x128xf32>
      %68 = vector.shape_cast %49 : vector<32x128xf32> to vector<4x8x128xf32>
      %cst_18 = arith.constant dense<0.000000e+00> : vector<8x128xf32>
      %69 = vector.multi_reduction <add>, %68, %cst_18 [0] : vector<4x8x128xf32> to vector<8x128xf32>
      %c0_19 = arith.constant 0 : index
      %c0_20 = arith.constant 0 : index
      %c0_21 = arith.constant 0 : index
      %c0_22 = arith.constant 0 : index
      %70 = vector.load %arg5[%c0_19, %c0_20, %c0_21, %c0_22] : memref<1x1x72x128xf32, #tpu.memory_space<vmem>>, vector<1x1x8x128xf32>
      %71 = vector.shape_cast %70 : vector<1x1x8x128xf32> to vector<8x128xf32>
      %72 = arith.addf %71, %69 : vector<8x128xf32>
      %c0_23 = arith.constant 0 : index
      %c0_24 = arith.constant 0 : index
      %c0_25 = arith.constant 0 : index
      %c0_26 = arith.constant 0 : index
      %73 = vector.load %arg5[%c0_23, %c0_24, %c0_25, %c0_26] : memref<1x1x72x128xf32, #tpu.memory_space<vmem>>, vector<1x1x8x128xf32>
      %74 = vector.shape_cast %73 : vector<1x1x8x128xf32> to vector<8x128xf32>
      %75 = vector.shape_cast %72 : vector<8x128xf32> to vector<1x1x8x128xf32>
      tpu.vector_store %arg5[%c0_23, %c0_24, %c0_25, %c0_26], %75 {strides = array<i32>} : memref<1x1x72x128xf32, #tpu.memory_space<vmem>>, vector<1x1x8x128xf32>,
      %76 = vector.shape_cast %38 : vector<32x128xf32> to vector<4x8x128xf32>
      %cst_27 = arith.constant dense<0.000000e+00> : vector<8x128xf32>
      %77 = vector.multi_reduction <add>, %76, %cst_27 [0] : vector<4x8x128xf32> to vector<8x128xf32>
      %c0_28 = arith.constant 0 : index
      %c0_29 = arith.constant 0 : index
      %c8 = arith.constant 8 : index
      %c0_30 = arith.constant 0 : index
      %78 = vector.load %arg5[%c0_28, %c0_29, %c8, %c0_30] : memref<1x1x72x128xf32, #tpu.memory_space<vmem>>, vector<1x1x8x128xf32>
      %79 = vector.shape_cast %78 : vector<1x1x8x128xf32> to vector<8x128xf32>
      %80 = arith.addf %79, %77 : vector<8x128xf32>
      %c0_31 = arith.constant 0 : index
      %c0_32 = arith.constant 0 : index
      %c8_33 = arith.constant 8 : index
      %c0_34 = arith.constant 0 : index
      %81 = vector.load %arg5[%c0_31, %c0_32, %c8_33, %c0_34] : memref<1x1x72x128xf32, #tpu.memory_space<vmem>>, vector<1x1x8x128xf32>
      %82 = vector.shape_cast %81 : vector<1x1x8x128xf32> to vector<8x128xf32>
      %83 = vector.shape_cast %80 : vector<8x128xf32> to vector<1x1x8x128xf32>
      tpu.vector_store %arg5[%c0_31, %c0_32, %c8_33, %c0_34], %83 {strides = array<i32>} : memref<1x1x72x128xf32, #tpu.memory_space<vmem>>, vector<1x1x8x128xf32>,
      %84 = vector.shape_cast %32 : vector<32x128xf32> to vector<4x8x128xf32>
      %cst_35 = arith.constant dense<0.000000e+00> : vector<8x128xf32>
      %85 = vector.multi_reduction <add>, %84, %cst_35 [0] : vector<4x8x128xf32> to vector<8x128xf32>
      %c0_36 = arith.constant 0 : index
      %c0_37 = arith.constant 0 : index
      %c16 = arith.constant 16 : index
      %c0_38 = arith.constant 0 : index
      %86 = vector.load %arg5[%c0_36, %c0_37, %c16, %c0_38] : memref<1x1x72x128xf32, #tpu.memory_space<vmem>>, vector<1x1x8x128xf32>
      %87 = vector.shape_cast %86 : vector<1x1x8x128xf32> to vector<8x128xf32>
      %88 = arith.addf %87, %85 : vector<8x128xf32>
      %c0_39 = arith.constant 0 : index
      %c0_40 = arith.constant 0 : index
      %c16_41 = arith.constant 16 : index
      %c0_42 = arith.constant 0 : index
      %89 = vector.load %arg5[%c0_39, %c0_40, %c16_41, %c0_42] : memref<1x1x72x128xf32, #tpu.memory_space<vmem>>, vector<1x1x8x128xf32>
      %90 = vector.shape_cast %89 : vector<1x1x8x128xf32> to vector<8x128xf32>
      %91 = vector.shape_cast %88 : vector<8x128xf32> to vector<1x1x8x128xf32>
      tpu.vector_store %arg5[%c0_39, %c0_40, %c16_41, %c0_42], %91 {strides = array<i32>} : memref<1x1x72x128xf32, #tpu.memory_space<vmem>>, vector<1x1x8x128xf32>,
      %92 = vector.shape_cast %55 : vector<32x128xf32> to vector<4x8x128xf32>
      %cst_43 = arith.constant dense<0.000000e+00> : vector<8x128xf32>
      %93 = vector.multi_reduction <add>, %92, %cst_43 [0] : vector<4x8x128xf32> to vector<8x128xf32>
      %c0_44 = arith.constant 0 : index
      %c0_45 = arith.constant 0 : index
      %c24 = arith.constant 24 : index
      %c0_46 = arith.constant 0 : index
      %94 = vector.load %arg5[%c0_44, %c0_45, %c24, %c0_46] : memref<1x1x72x128xf32, #tpu.memory_space<vmem>>, vector<1x1x8x128xf32>
      %95 = vector.shape_cast %94 : vector<1x1x8x128xf32> to vector<8x128xf32>
      %96 = arith.addf %95, %93 : vector<8x128xf32>
      %c0_47 = arith.constant 0 : index
      %c0_48 = arith.constant 0 : index
      %c24_49 = arith.constant 24 : index
      %c0_50 = arith.constant 0 : index
      %97 = vector.load %arg5[%c0_47, %c0_48, %c24_49, %c0_50] : memref<1x1x72x128xf32, #tpu.memory_space<vmem>>, vector<1x1x8x128xf32>
      %98 = vector.shape_cast %97 : vector<1x1x8x128xf32> to vector<8x128xf32>
      %99 = vector.shape_cast %96 : vector<8x128xf32> to vector<1x1x8x128xf32>
      tpu.vector_store %arg5[%c0_47, %c0_48, %c24_49, %c0_50], %99 {strides = array<i32>} : memref<1x1x72x128xf32, #tpu.memory_space<vmem>>, vector<1x1x8x128xf32>,
      %100 = vector.shape_cast %54 : vector<32x128xf32> to vector<4x8x128xf32>
      %cst_51 = arith.constant dense<0.000000e+00> : vector<8x128xf32>
      %101 = vector.multi_reduction <add>, %100, %cst_51 [0] : vector<4x8x128xf32> to vector<8x128xf32>
      %c0_52 = arith.constant 0 : index
      %c0_53 = arith.constant 0 : index
      %c32 = arith.constant 32 : index
      %c0_54 = arith.constant 0 : index
      %102 = vector.load %arg5[%c0_52, %c0_53, %c32, %c0_54] : memref<1x1x72x128xf32, #tpu.memory_space<vmem>>, vector<1x1x8x128xf32>
      %103 = vector.shape_cast %102 : vector<1x1x8x128xf32> to vector<8x128xf32>
      %104 = arith.addf %103, %101 : vector<8x128xf32>
      %c0_55 = arith.constant 0 : index
      %c0_56 = arith.constant 0 : index
      %c32_57 = arith.constant 32 : index
      %c0_58 = arith.constant 0 : index
      %105 = vector.load %arg5[%c0_55, %c0_56, %c32_57, %c0_58] : memref<1x1x72x128xf32, #tpu.memory_space<vmem>>, vector<1x1x8x128xf32>
      %106 = vector.shape_cast %105 : vector<1x1x8x128xf32> to vector<8x128xf32>
      %107 = vector.shape_cast %104 : vector<8x128xf32> to vector<1x1x8x128xf32>
      tpu.vector_store %arg5[%c0_55, %c0_56, %c32_57, %c0_58], %107 {strides = array<i32>} : memref<1x1x72x128xf32, #tpu.memory_space<vmem>>, vector<1x1x8x128xf32>,
      %108 = vector.shape_cast %61 : vector<32x128xf32> to vector<4x8x128xf32>
      %cst_59 = arith.constant dense<0.000000e+00> : vector<8x128xf32>
      %109 = vector.multi_reduction <add>, %108, %cst_59 [0] : vector<4x8x128xf32> to vector<8x128xf32>
      %c0_60 = arith.constant 0 : index
      %c0_61 = arith.constant 0 : index
      %c40 = arith.constant 40 : index
      %c0_62 = arith.constant 0 : index
      %110 = vector.load %arg5[%c0_60, %c0_61, %c40, %c0_62] : memref<1x1x72x128xf32, #tpu.memory_space<vmem>>, vector<1x1x8x128xf32>
      %111 = vector.shape_cast %110 : vector<1x1x8x128xf32> to vector<8x128xf32>
      %112 = arith.addf %111, %109 : vector<8x128xf32>
      %c0_63 = arith.constant 0 : index
      %c0_64 = arith.constant 0 : index
      %c40_65 = arith.constant 40 : index
      %c0_66 = arith.constant 0 : index
      %113 = vector.load %arg5[%c0_63, %c0_64, %c40_65, %c0_66] : memref<1x1x72x128xf32, #tpu.memory_space<vmem>>, vector<1x1x8x128xf32>
      %114 = vector.shape_cast %113 : vector<1x1x8x128xf32> to vector<8x128xf32>
      %115 = vector.shape_cast %112 : vector<8x128xf32> to vector<1x1x8x128xf32>
      tpu.vector_store %arg5[%c0_63, %c0_64, %c40_65, %c0_66], %115 {strides = array<i32>} : memref<1x1x72x128xf32, #tpu.memory_space<vmem>>, vector<1x1x8x128xf32>,
      %116 = vector.shape_cast %60 : vector<32x128xf32> to vector<4x8x128xf32>
      %cst_67 = arith.constant dense<0.000000e+00> : vector<8x128xf32>
      %117 = vector.multi_reduction <add>, %116, %cst_67 [0] : vector<4x8x128xf32> to vector<8x128xf32>
      %c0_68 = arith.constant 0 : index
      %c0_69 = arith.constant 0 : index
      %c48 = arith.constant 48 : index
      %c0_70 = arith.constant 0 : index
      %118 = vector.load %arg5[%c0_68, %c0_69, %c48, %c0_70] : memref<1x1x72x128xf32, #tpu.memory_space<vmem>>, vector<1x1x8x128xf32>
      %119 = vector.shape_cast %118 : vector<1x1x8x128xf32> to vector<8x128xf32>
      %120 = arith.addf %119, %117 : vector<8x128xf32>
      %c0_71 = arith.constant 0 : index
      %c0_72 = arith.constant 0 : index
      %c48_73 = arith.constant 48 : index
      %c0_74 = arith.constant 0 : index
      %121 = vector.load %arg5[%c0_71, %c0_72, %c48_73, %c0_74] : memref<1x1x72x128xf32, #tpu.memory_space<vmem>>, vector<1x1x8x128xf32>
      %122 = vector.shape_cast %121 : vector<1x1x8x128xf32> to vector<8x128xf32>
      %123 = vector.shape_cast %120 : vector<8x128xf32> to vector<1x1x8x128xf32>
      tpu.vector_store %arg5[%c0_71, %c0_72, %c48_73, %c0_74], %123 {strides = array<i32>} : memref<1x1x72x128xf32, #tpu.memory_space<vmem>>, vector<1x1x8x128xf32>,
      %124 = vector.shape_cast %67 : vector<32x128xf32> to vector<4x8x128xf32>
      %cst_75 = arith.constant dense<0.000000e+00> : vector<8x128xf32>
      %125 = vector.multi_reduction <add>, %124, %cst_75 [0] : vector<4x8x128xf32> to vector<8x128xf32>
      %c0_76 = arith.constant 0 : index
      %c0_77 = arith.constant 0 : index
      %c56 = arith.constant 56 : index
      %c0_78 = arith.constant 0 : index
      %126 = vector.load %arg5[%c0_76, %c0_77, %c56, %c0_78] : memref<1x1x72x128xf32, #tpu.memory_space<vmem>>, vector<1x1x8x128xf32>
      %127 = vector.shape_cast %126 : vector<1x1x8x128xf32> to vector<8x128xf32>
      %128 = arith.addf %127, %125 : vector<8x128xf32>
      %c0_79 = arith.constant 0 : index
      %c0_80 = arith.constant 0 : index
      %c56_81 = arith.constant 56 : index
      %c0_82 = arith.constant 0 : index
      %129 = vector.load %arg5[%c0_79, %c0_80, %c56_81, %c0_82] : memref<1x1x72x128xf32, #tpu.memory_space<vmem>>, vector<1x1x8x128xf32>
      %130 = vector.shape_cast %129 : vector<1x1x8x128xf32> to vector<8x128xf32>
      %131 = vector.shape_cast %128 : vector<8x128xf32> to vector<1x1x8x128xf32>
      tpu.vector_store %arg5[%c0_79, %c0_80, %c56_81, %c0_82], %131 {strides = array<i32>} : memref<1x1x72x128xf32, #tpu.memory_space<vmem>>, vector<1x1x8x128xf32>,
      %132 = vector.shape_cast %66 : vector<32x128xf32> to vector<4x8x128xf32>
      %cst_83 = arith.constant dense<0.000000e+00> : vector<8x128xf32>
      %133 = vector.multi_reduction <add>, %132, %cst_83 [0] : vector<4x8x128xf32> to vector<8x128xf32>
      %c0_84 = arith.constant 0 : index
      %c0_85 = arith.constant 0 : index
      %c64 = arith.constant 64 : index
      %c0_86 = arith.constant 0 : index
      %134 = vector.load %arg5[%c0_84, %c0_85, %c64, %c0_86] : memref<1x1x72x128xf32, #tpu.memory_space<vmem>>, vector<1x1x8x128xf32>
      %135 = vector.shape_cast %134 : vector<1x1x8x128xf32> to vector<8x128xf32>
      %136 = arith.addf %135, %133 : vector<8x128xf32>
      %c0_87 = arith.constant 0 : index
      %c0_88 = arith.constant 0 : index
      %c64_89 = arith.constant 64 : index
      %c0_90 = arith.constant 0 : index
      %137 = vector.load %arg5[%c0_87, %c0_88, %c64_89, %c0_90] : memref<1x1x72x128xf32, #tpu.memory_space<vmem>>, vector<1x1x8x128xf32>
      %138 = vector.shape_cast %137 : vector<1x1x8x128xf32> to vector<8x128xf32>
      %139 = vector.shape_cast %136 : vector<8x128xf32> to vector<1x1x8x128xf32>
      tpu.vector_store %arg5[%c0_87, %c0_88, %c64_89, %c0_90], %139 {strides = array<i32>} : memref<1x1x72x128xf32, #tpu.memory_space<vmem>>, vector<1x1x8x128xf32>,
    } else {
    }
    return
  }
  func.func @transform_0(%arg0: i32, %arg1: i32, %arg2: i32) -> (i32, i32, i32) {
    %c0_i32 = arith.constant 0 : i32
    %c0_i32_0 = arith.constant 0 : i32
    return %arg1, %arg2, %c0_i32 : i32, i32, i32
  }
  func.func @transform_1(%arg0: i32, %arg1: i32, %arg2: i32) -> (i32, i32, i32) {
    %c0_i32 = arith.constant 0 : i32
    %c0_i32_0 = arith.constant 0 : i32
    return %arg1, %arg2, %c0_i32 : i32, i32, i32
  }
  func.func @transform_2(%arg0: i32, %arg1: i32, %arg2: i32) -> (i32, i32, i32, i32) {
    %c0_i32 = arith.constant 0 : i32
    %c0_i32_0 = arith.constant 0 : i32
    %c0_i32_1 = arith.constant 0 : i32
    return %arg0, %arg1, %c0_i32, %c0_i32_0 : i32, i32, i32, i32
  }
}

</mosaic_0001>

<bundles_post_ra>
// kernel: bce_with_logits_metrics_batched.1
= control target key start
LH: loop header
LB: loop body
LE: loop exit
PB: predicated region body
PF: predicated region fallthrough
CT: control target
= control target key end

     0   :  { %s914_s9 = smov 0   ;;  %s916_s10 = smov 0   ;;  %s1138_s0 = inlined_call_operand.vmem [shape: f32[2,1,128], index: 0, kind: input, shape index: {}]   ;;  %s1139_s1 = inlined_call_operand.vmem [shape: s8[2,32,128], index: 1, kind: input, shape index: {}]   ;;  %s1140_s2 = inlined_call_operand.vmem [shape: f32[1,2,72,128], index: 2, kind: output, shape index: {}]  }
   0x1   :  { %s918_s11 = smov 0  }
   0x2 LB: > { %s27_s12 = sadd.s32 1, %s891_s10  ;;  %p797_p0 = scmp.ge.s32.totalorder %s895_s11, 1  ;;  %s895_s11 = sphi %s918_s11, %s12_s11   ;;  %s891_s10 = sphi %s916_s10, %s1146_s10   ;;  %s887_s9 = sphi %s914_s9, %s1145_s9  }
   0x3   : > { %p29_p1 = scmp.ge.s32.totalorder %s27_s12, 2  ;;  %p156_p2 = scmp.lt.s32.totalorder %s895_s11, 3 }
   0x5   : > { %s1148_s12 = smov (%p29_p1, %s27_s12), 0  ;;  %p157_p3 = pnand %p797_p0, %p156_p2 }
   0x6   : > { %p196_p4 = scmp.lt.s32.totalorder (!%p157_p3), %s887_s9, 1 }
   0x7   : > { %160 = sbr.rel (%p157_p3) target bundleno = 78 (0x4e), region = 28 }
   0xc   : > { %v453_v0 = vlaneseq  ;;  %s1150_s9 = smov (!%p196_p4, %s887_s9), 1  ;;  %v897_v23 = vmov 0.0   ;;  %v898_v37 = vmov 0.1  }
   0xd   : > { %s798_s13 = sshll.u32 %s1150_s9, 3  ;;  %s201_s19 = scalar_lea.vmem %s1138_s0, %s1150_s9 }
   0xe   : > { %v454_v1 = vshrl.u32 %v453_v0, 7  ;;  %v459_v2 = vand.u32 127, %v453_v0  ;;  %s211_s16 = scalar_lea.vmem %s1139_s1, %s798_s13  ;;  %v440_v25 = vld [vmem:[%s201_s19] sm:$0xff]  ;;  %v441_v30 = vld [vmem:[%s201_s19 + $0x8] sm:$0xff]  ;;  %v442_v31 = vld [vmem:[%s201_s19 + $0x10] sm:$0xff]  ;;  %s830_s20 = smul.u32 72, %s1150_s9 }
   0xf   : > { %v444_v10 = vld [vmem:[%s211_s16] sm:$0xff]  ;;  %v443_v32 = vld [vmem:[%s201_s19 + $0x18] sm:$0xff] }
  0x10   : > { %v455_v3 = vadd.s32 8, %v454_v1  ;;  %v456_v4 = vadd.s32 16, %v454_v1  ;;  %v457_v5 = vadd.s32 24, %v454_v1  ;;  %v466_v6 = vmul.u32 128, %v454_v1  ;;  %s1019_s23 = scalar_lea.vmem %s1140_s2, %s830_s20 }
  0x11   : > { %v445_v12 = vunpack.c.0.s8 %v444_v10  ;;  %v446_v13 = vunpack.c.1.s8 %v444_v10  ;;  %v447_v14 = vunpack.c.2.s8 %v444_v10  ;;  %v448_v15 = vunpack.c.3.s8 %v444_v10 }
  0x12   : > { %v467_v7 = vmul.u32 128, %v455_v3  ;;  %v468_v8 = vmul.u32 128, %v456_v4  ;;  %v470_v9 = vadd.s32 %v466_v6, %v459_v2 }
  0x13   : > { %v469_v11 = vmul.u32 128, %v457_v5  ;;  %v449_v19 = vcvt.s32.f32 %v445_v12  ;;  %v450_v20 = vcvt.s32.f32 %v446_v13  ;;  %v451_v21 = vcvt.s32.f32 %v447_v14 }
  0x14   : > { %v471_v16 = vadd.s32 %v467_v7, %v459_v2  ;;  %v472_v17 = vadd.s32 %v468_v8, %v459_v2  ;;  %vm474_vm0 = vcmp.lt.s32.totalorder %v470_v9, 16  ;;  %v452_v22 = vcvt.s32.f32 %v448_v15 }
  0x15   : > { %v473_v18 = vadd.s32 %v469_v11, %v459_v2  ;;  %v944_v24 = vsel %vm474_vm0, 1.0, %v897_v23  ;;  %v971_v36 = vsel %vm474_vm0, %v440_v25, 0.0 }
  0x16   : > { %vm475_vm1 = vcmp.lt.s32.totalorder %v471_v16, 16  ;;  %vm476_vm2 = vcmp.lt.s32.totalorder %v472_v17, 16  ;;  %v959_v29 = vmul.f32 %v944_v24, %v449_v19  ;;  %v518_v46 = vand.u32 2147483647, %v971_v36 }
  0x17   : > { %vm477_vm3 = vcmp.lt.s32.totalorder %v473_v18, 16  ;;  %v948_v26 = vsel %vm475_vm1, 1.0, %v897_v23  ;;  %v952_v27 = vsel %vm476_vm2, 1.0, %v897_v23  ;;  %v978_v39 = vsel %vm475_vm1, %v441_v30, 0.0 }
  0x18   : > { %v956_v28 = vsel %vm477_vm3, 1.0, %v897_v23  ;;  %v962_v33 = vmul.f32 %v948_v26, %v450_v20  ;;  %v965_v34 = vmul.f32 %v952_v27, %v451_v21  ;;  %vm494_vm4 = vcmp.eq.f32.partialorder %v959_v29, 1.0 }
  0x19   : > { %v968_v35 = vmul.f32 %v956_v28, %v452_v22  ;;  %v498_v38 = vsel %vm494_vm4, 1.0, %v898_v37  ;;  %v981_v40 = vsel %vm476_vm2, %v442_v31, 0.0  ;;  %v984_v41 = vsel %vm477_vm3, %v443_v32, 0.0 }
  0x1a   : > { %vm495_vm5 = vcmp.eq.f32.partialorder %v962_v33, 1.0  ;;  %vm496_vm6 = vcmp.eq.f32.partialorder %v965_v34, 1.0  ;;  %v987_v45 = vmul.f32 %v944_v24, %v498_v38  ;;  %v519_v48 = vand.u32 2147483647, %v978_v39 }
  0x1b   : > { %vm497_vm7 = vcmp.eq.f32.partialorder %v968_v35, 1.0  ;;  %v499_v42 = vsel %vm495_vm5, 1.0, %v898_v37  ;;  %v500_v43 = vsel %vm496_vm6, 1.0, %v898_v37  ;;  %v520_v49 = vand.u32 2147483647, %v981_v40 }
  0x1c   : > { %v501_v44 = vsel %vm497_vm7, 1.0, %v898_v37  ;;  %v991_v47 = vmul.f32 %v948_v26, %v499_v42  ;;  %v521_v50 = vand.u32 2147483647, %v984_v41  ;;  %v997_v51 = vmul.f32 %v952_v27, %v500_v43 }
  0x1d   : > { %v1000_v52 = vmul.f32 %v956_v28, %v501_v44  ;;  %v522_v53 = vsub.f32 0.0, %v518_v46  ;;  %v523_v54 = vsub.f32 0.0, %v519_v48  ;;  %v524_v55 = vsub.f32 0.0, %v520_v49 }
  0x1e   : > { %v525_v56 = vsub.f32 0.0, %v521_v50  ;;  %v644_v57 = vadd.f32 %v991_v47, %v987_v45  ;;  %v650_v59 = vadd.f32 %v962_v33, %v959_v29  ;;  %vm578_vm8 = vcmp.gt.f32.partialorder %v971_v36, 0.0 }
  0x1f   : > { %v526_v58 = vmul.f32 1.442695, %v522_v53  ;;  %vm579_vm9 = vcmp.gt.f32.partialorder %v978_v39, 0.0  ;;  %v528_v60 = vmul.f32 1.442695, %v523_v54  ;;  %vm580_vm10 = vcmp.gt.f32.partialorder %v981_v40, 0.0 }
  0x20   : > { %v530_v61 = vmul.f32 1.442695, %v524_v55  ;;  %v532_v62 = vmul.f32 1.442695, %v525_v56  ;;  %v645_v63 = vadd.f32 %v644_v57, %v997_v51  ;;  %v651_v0 = vadd.f32 %v650_v59, %v965_v34 }
  0x21   : > { %857 = vpow2.f32 %v526_v58  ;;  %vm581_vm11 = vcmp.gt.f32.partialorder %v984_v41, 0.0  ;;  %v816_v2 = vsel %vm578_vm8, 1.0, %v897_v23  ;;  %v817_v3 = vsel %vm579_vm9, 1.0, %v897_v23 }
  0x22   : > { %859 = vpow2.f32 %v528_v60  ;;  %v646_v1 = vadd.f32 %v645_v63, %v1000_v52  ;;  %v652_v4 = vadd.f32 %v651_v0, %v968_v35  ;;  %v818_v5 = vsel %vm580_vm10, 1.0, %v897_v23 }
  0x23   : > { %861 = vpow2.f32 %v530_v61  ;;  %v819_v6 = vsel %vm581_vm11, 1.0, %v897_v23  ;;  %v590_v7 = vmul.f32 %v816_v2, %v944_v24  ;;  %v591_v8 = vmul.f32 %v817_v3, %v948_v26 }
  0x24   : > { %863 = vpow2.f32 %v532_v62  ;;  %v592_v9 = vmul.f32 %v818_v5, %v952_v27  ;;  %v593_v10 = vmul.f32 %v819_v6, %v956_v28  ;;  %vm598_vm12 = vcmp.gt.f32.partialorder %v971_v36, 1.0986123  ;;  %649 = vst [vmem:[%s1019_s23 + $0x8] sm:$0xff] %v646_v1  ;;  %655 = vst [vmem:[%s1019_s23 + $0x10] sm:$0xff] %v652_v4 }
  0x25   : > { %v594_v11 = vmul.f32 %v590_v7, %v959_v29  ;;  %v595_v12 = vmul.f32 %v591_v8, %v962_v33  ;;  %v662_v13 = vadd.f32 %v591_v8, %v590_v7  ;;  %vm599_vm13 = vcmp.gt.f32.partialorder %v978_v39, 1.0986123 }
  0x26   : > { %v596_v14 = vmul.f32 %v592_v9, %v965_v34  ;;  %v597_v15 = vmul.f32 %v593_v10, %v968_v35  ;;  %vm600_vm14 = vcmp.gt.f32.partialorder %v981_v40, 1.0986123  ;;  %vm601_vm15 = vcmp.gt.f32.partialorder %v984_v41, 1.0986123 }
  0x27   : > { %v656_v16 = vadd.f32 %v595_v12, %v594_v11  ;;  %v663_v17 = vadd.f32 %v662_v13, %v592_v9  ;;  %v820_v18 = vsel %vm598_vm12, 1.0, %v897_v23  ;;  %v821_v19 = vsel %vm599_vm13, 1.0, %v897_v23 }
  0x28   : > { %v822_v20 = vsel %vm600_vm14, 1.0, %v897_v23  ;;  %v823_v21 = vsel %vm601_vm15, 1.0, %v897_v23  ;;  %v610_v22 = vmul.f32 %v820_v18, %v944_v24  ;;  %v611_v25 = vmul.f32 %v821_v19, %v948_v26 }
  0x29   : > { %v657_v30 = vadd.f32 %v656_v16, %v596_v14  ;;  %v664_v31 = vadd.f32 %v663_v17, %v593_v10  ;;  %v612_v32 = vmul.f32 %v822_v20, %v952_v27  ;;  %v613_v44 = vmul.f32 %v823_v21, %v956_v28 }
  0x2a   : > { %v614_v37 = vmul.f32 %v610_v22, %v959_v29  ;;  %v615_v38 = vmul.f32 %v611_v25, %v962_v33  ;;  %v674_v42 = vadd.f32 %v611_v25, %v610_v22  ;;  %vm618_vm0 = vcmp.gt.f32.partialorder %v971_v36, 2.944439 }
  0x2b   : > { %v658_v43 = vadd.f32 %v657_v30, %v597_v15  ;;  %v616_v46 = vmul.f32 %v612_v32, %v965_v34  ;;  %667 = vst [vmem:[%s1019_s23 + $0x20] sm:$0xff] %v664_v31  ;;  %v617_v57 = vmul.f32 %v613_v44, %v968_v35  ;;  %vm619_vm1 = vcmp.gt.f32.partialorder %v978_v39, 2.944439 }
  0x2c   : > { %v668_v48 = vadd.f32 %v615_v38, %v614_v37  ;;  %v675_v49 = vadd.f32 %v674_v42, %v612_v32  ;;  %v506_v62 = vmax.f32 %v971_v36, 0.0  ;;  %v507_v63 = vmax.f32 %v978_v39, 0.0 }
  0x2d   : > { %661 = vst [vmem:[%s1019_s23 + $0x18] sm:$0xff] %v658_v43  ;;  %v508_v0 = vmax.f32 %v981_v40, 0.0  ;;  %v509_v1 = vmax.f32 %v984_v41, 0.0  ;;  %vm620_vm2 = vcmp.gt.f32.partialorder %v981_v40, 2.944439  ;;  %v824_v4 = vsel %vm618_vm0, 1.0, %v897_v23 }
  0x2e   : > { %v1049_v50 = vpop.eup %857  ;;  %v669_v60 = vadd.f32 %v668_v48, %v616_v46  ;;  %v676_v61 = vadd.f32 %v675_v49, %v613_v44  ;;  %vm621_vm3 = vcmp.gt.f32.partialorder %v984_v41, 2.944439  ;;  %v825_v5 = vsel %vm619_vm1, 1.0, %v897_v23 }
  0x2f   : > { %v1052_v53 = vpop.eup %859  ;;  %v534_v54 = vadd.f32 1.0, %v1049_v50  ;;  %v537_v3 = vmul.f32 -0.5, %v1049_v50  ;;  %v510_v6 = vmul.f32 %v959_v29, %v971_v36  ;;  %v511_v8 = vmul.f32 %v962_v33, %v978_v39 }
  0x30   : > { %v1055_v55 = vpop.eup %861  ;;  %v543_v56 = vadd.f32 1.0, %v1052_v53  ;;  %v670_v7 = vadd.f32 %v669_v60, %v617_v57  ;;  %v546_v9 = vmul.f32 -0.5, %v1052_v53  ;;  %v826_v11 = vsel %vm620_vm2, 1.0, %v897_v23  ;;  %679 = vst [vmem:[%s1019_s23 + $0x30] sm:$0xff] %v676_v61 }
  0x31   : > { %v1062_v58 = vpop.eup %863  ;;  %865 = vlog2.f32 %v534_v54  ;;  %v552_v59 = vadd.f32 1.0, %v1055_v55  ;;  %v555_v10 = vmul.f32 -0.5, %v1055_v55  ;;  %v827_v12 = vsel %vm621_vm3, 1.0, %v897_v23 }
  0x32   : > { %867 = vlog2.f32 %v543_v56  ;;  %v561_v2 = vadd.f32 1.0, %v1062_v58  ;;  %v630_v13 = vmul.f32 %v824_v4, %v944_v24  ;;  %v631_v14 = vmul.f32 %v825_v5, %v948_v26  ;;  %673 = vst [vmem:[%s1019_s23 + $0x28] sm:$0xff] %v670_v7 }
  0x33   : > { %869 = vlog2.f32 %v552_v59  ;;  %v512_v36 = vmul.f32 %v965_v34, %v981_v40  ;;  %v538_v15 = vadd.f32 1.0, %v537_v3  ;;  %v632_v16 = vmul.f32 %v826_v11, %v952_v27 }
  0x34   : > { %871 = vlog2.f32 %v561_v2  ;;  %v633_v39 = vmul.f32 %v827_v12, %v956_v28  ;;  %v564_v17 = vmul.f32 -0.5, %v1062_v58  ;;  %v634_v18 = vmul.f32 %v630_v13, %v959_v29 }
  0x35   : > { %v635_v19 = vmul.f32 %v631_v14, %v962_v33  ;;  %v686_v23 = vadd.f32 %v631_v14, %v630_v13  ;;  %v540_v24 = vand.u32 2147483647, %v1049_v50  ;;  %v547_v20 = vadd.f32 1.0, %v546_v9 }
  0x36   : > { %v549_v26 = vand.u32 2147483647, %v1052_v53  ;;  %v636_v40 = vmul.f32 %v632_v16, %v965_v34  ;;  %v556_v21 = vadd.f32 1.0, %v555_v10  ;;  %v637_v27 = vmul.f32 %v633_v39, %v968_v35 }
  0x37   : > { %v680_v22 = vadd.f32 %v635_v19, %v634_v18  ;;  %v687_v28 = vadd.f32 %v686_v23, %v632_v16  ;;  %v513_v25 = vmul.f32 %v968_v35, %v984_v41  ;;  %v514_v30 = vsub.f32 %v506_v62, %v510_v6 }
  0x38   : > { %v515_v29 = vsub.f32 %v507_v63, %v511_v8  ;;  %v558_v33 = vand.u32 2147483647, %v1055_v55  ;;  %v539_v31 = vmul.f32 %v1049_v50, %v538_v15  ;;  %v565_v32 = vadd.f32 1.0, %v564_v17 }
  0x39   : > { %v681_v37 = vadd.f32 %v680_v22, %v636_v40  ;;  %v688_v38 = vadd.f32 %v687_v28, %v633_v39  ;;  %vm1106_vm4 = vcmp.lt.f32.partialorder %v540_v24, 0.0004427343  ;;  %v548_v43 = vmul.f32 %v1052_v53, %v547_v20 }
  0x3a   : > { %vm1111_vm5 = vcmp.lt.f32.partialorder %v549_v26, 0.0004427343  ;;  %v567_v35 = vand.u32 2147483647, %v1062_v58  ;;  %v557_v48 = vmul.f32 %v1055_v55, %v556_v21  ;;  %v516_v54 = vsub.f32 %v508_v0, %v512_v36 }
  0x3b   : > { %v682_v49 = vadd.f32 %v681_v37, %v637_v27  ;;  %vm559_vm6 = vcmp.lt.f32.partialorder %v558_v33, 0.0004427343  ;;  %v566_v59 = vmul.f32 %v1062_v58, %v565_v32  ;;  %691 = vst [vmem:[%s1019_s23 + $0x40] sm:$0xff] %v688_v38  ;;  %v517_v61 = vsub.f32 %v509_v1, %v513_v25 }
  0x3c   : > { %vm568_vm7 = vcmp.lt.f32.partialorder %v567_v35, 0.0004427343 }
  0x3d   : > { %685 = vst [vmem:[%s1019_s23 + $0x38] sm:$0xff] %v682_v49 }
  0x3e   : > { %v866_v42 = vpop.eup %865 }
  0x3f   : > { %v868_v41 = vpop.eup %867  ;;  %v536_v46 = vmul.f32 0.6931472, %v866_v42 }
  0x40   : > { %v870_v50 = vpop.eup %869  ;;  %v545_v56 = vmul.f32 0.6931472, %v868_v41 }
  0x41   : > { %v542_v57 = vsel %vm1106_vm4, %v539_v31, %v536_v46  ;;  %v554_v53 = vmul.f32 0.6931472, %v870_v50  ;;  %v872_v60 = vpop.eup %871 }
  0x42   : > { %v551_v62 = vsel %vm1111_vm5, %v548_v43, %v545_v56  ;;  %v570_v55 = vadd.f32 %v542_v57, %v514_v30  ;;  %v563_v2 = vmul.f32 0.6931472, %v872_v60 }
  0x43   : > { %v560_v63 = vsel %vm559_vm6, %v557_v48, %v554_v53  ;;  %v571_v0 = vadd.f32 %v551_v62, %v515_v29 }
  0x44   : > { %v572_v3 = vadd.f32 %v560_v63, %v516_v54  ;;  %v574_v4 = vmul.f32 %v570_v55, %v987_v45  ;;  %v569_v5 = vsel %vm568_vm7, %v566_v59, %v563_v2 }
  0x45   : > { %v575_v6 = vmul.f32 %v571_v0, %v991_v47  ;;  %v573_v58 = vadd.f32 %v569_v5, %v517_v61 }
  0x46   : > { %v576_v7 = vmul.f32 %v572_v3, %v997_v51 }
  0x47   : > { %v638_v1 = vadd.f32 %v575_v6, %v574_v4  ;;  %v577_v8 = vmul.f32 %v573_v58, %v1000_v52 }
  0x49   : > { %v639_v9 = vadd.f32 %v638_v1, %v576_v7 }
  0x4b   : > { %v640_v10 = vadd.f32 %v639_v9, %v577_v8 }
  0x4d   : > { %643 = vst [vmem:[%s1019_s23] sm:$0xff] %v640_v10 }
  0x4e PF: > { %s12_s11 = sadd.s32 1, %s895_s11   ;;  %s1145_s9 = smov %s891_s10 }
  0x4f   : > { %p9_p5 = scmp.ge.s32.totalorder %s12_s11, 4   ;;  %s1146_s10 = smov %s1148_s12 }
  0x51   :  { %11 = sbr.rel (!%p9_p5) target bundleno = 2 (0x2), region = 73 }

</bundles_post_ra>
